<compile_context>
chip_gen: v7x
topology: tpu7x:2x2x1
jax: 0.10.0
libtpu: 0.0.40
codegen_flags: <defaults>
</compile_context>

<pallas_src>
import jax
import jax.numpy as jnp
from jax.experimental import pallas as pl
from jax.experimental.pallas import tpu as pltpu


def lstm_kernel(x_ref, wih0_ref, b0_ref, wih1_ref, b1_ref, y_ref):
    H = y_ref.shape[-1]            # hidden_dim (= 32)
    H4 = 4 * H                     # 128 = one vreg lane width
    tb = x_ref.shape[0]

    # Lane mask selecting gate block 0; built once, reused by both layers.
    lane = jax.lax.broadcasted_iota(jnp.int32, (tb, H4), 1)
    blk0 = lane < H

    def cell(h_in, w_ref, b_ref):
        # Gate columns are pre-ordered [i, o, g, o]; the i/o columns and biases are
        # pre-scaled by 0.5 so sigmoid(z) = 0.5 * tanh(z/2) + 0.5 costs no extra
        # EUP pass (only one full-slab tanh per gate slab).
        g = jnp.dot(h_in, w_ref[...], preferred_element_type=jnp.float32) + b_ref[...]
        t = jnp.tanh(g)                                    # EUP pass 1 (full 128-lane slab)
        sig = 0.5 * t + 0.5                                # sigmoid(i), sigmoid(o)  (VPU only)
        # 2H roll swaps block pairs regardless of direction: block 0 = sigmoid(i)*tanh(g) = c.
        c_slab = sig * pltpu.roll(t, shift=2 * H, axis=1)
        tc = jnp.where(blk0, jnp.tanh(c_slab), 0.0)        # EUP pass 2; tanh(c) kept on block 0
        # H roll brings block 1 OR block 3 onto block 0 -- both hold sigmoid(o).
        return pltpu.roll(sig, shift=H, axis=1) * tc       # [h, 0, 0, 0]

    xb = x_ref[...].astype(wih0_ref.dtype)                 # bf16 MXU operand (math stays f32)
    h0 = cell(xb, wih0_ref, b0_ref)                        # layer-0 hidden lives in block 0
    h1 = cell(h0.astype(wih1_ref.dtype), wih1_ref, b1_ref)
    y_ref[...] = h1[:, :H]                                 # compact (tb, H) store (4x fewer HBM bytes)


def _choose_tb(B, tb_max=256):
    """Batch tile: multiple of 8, capped at tb_max, and >= 2 grid steps whenever the
    batch allows so ("parallel",) can shard across 2 TensorCores (v7x)."""
    if B <= 8:
        return B                              # block == full batch dim (allowed)
    tb = min(tb_max, (B // 8) * 8)
    if pl.cdiv(B, tb) < 2 and B >= 16:
        tb = max(8, ((B // 2) // 8) * 8)
    return tb


def lstm_forward(x_nchw, params, *, tb_max=256):
    """x_nchw: (B, C, H, W) float32.  Returns y: (B, 1, hidden_dim)."""
    B = x_nchw.shape[0]
    x2d = x_nchw.reshape(B, -1)               # glue reshape of x.view(B, 1, -1)
    D = x2d.shape[1]
    H4 = params["b0"].shape[-1]
    H = H4 // 4
    assert H4 == 128, "lane tricks assume 4*hidden_dim == one vreg lane width (128)"

    tb = _choose_tb(B, tb_max)
    grid = (pl.cdiv(B, tb),)                  # no jnp.pad: Pallas masks the partial edge block

    # Weights are small here (D = C*H*W, 4H = 128) and stay whole-array resident in
    # VMEM (constant index_map => no re-DMA per grid step).  For very large D add a
    # K-tiled grid axis over D with a pl.when-initialized accumulator and/or raise
    # vmem_limit_bytes (v7x has only 64 MiB physical / 32 MiB scoped default).
    y2d = pl.pallas_call(
        lstm_kernel,
        out_shape=jax.ShapeDtypeStruct((B, H), jnp.float32),
        grid_spec=pltpu.PrefetchScalarGridSpec(
            num_scalar_prefetch=0,
            grid=grid,
            in_specs=[
                pl.BlockSpec((tb, D), lambda i: (i, 0)),     # x batch tile
                pl.BlockSpec((D, H4), lambda i: (0, 0)),     # wih0T   (resident)
                pl.BlockSpec((1, H4), lambda i: (0, 0)),     # b0
                pl.BlockSpec((H4, H4), lambda i: (0, 0)),    # wih1T   (zero-padded, resident)
                pl.BlockSpec((1, H4), lambda i: (0, 0)),     # b1
            ],
            out_specs=pl.BlockSpec((tb, H), lambda i: (i, 0)),
        ),
        compiler_params=pltpu.CompilerParams(
            dimension_semantics=("parallel",)),              # shards grid across TCs on v7x
    )(x2d, params["wih0T"], params["b0"], params["wih1T"], params["b1"])

    return y2d.reshape(B, 1, H)


def init_torch_params(key, input_size, hidden_dim):
    """PyTorch nn.LSTM-style init: every tensor ~ U(-1/sqrt(H), 1/sqrt(H)).
    Returned in the raw PyTorch layout (gate rows ordered i, f, g, o)."""
    H = hidden_dim
    bound = 1.0 / jnp.sqrt(jnp.float32(H))
    ks = jax.random.split(key, 8)

    def u(k, shape):
        return jax.random.uniform(k, shape, jnp.float32, -bound, bound)

    return {
        "wih0": u(ks[0], (4 * H, input_size)), "whh0": u(ks[1], (4 * H, H)),
        "bih0": u(ks[2], (4 * H,)),            "bhh0": u(ks[3], (4 * H,)),
        "wih1": u(ks[4], (4 * H, H)),          "whh1": u(ks[5], (4 * H, H)),
        "bih1": u(ks[6], (4 * H,)),            "bhh1": u(ks[7], (4 * H,)),
    }


def prepare_params(raw, *, matmul_dtype=jnp.bfloat16):
    """One-time glue (plain JAX):
      * transpose input weights to (in, 4H) and reorder gate columns
        i,f,g,o -> i,o,g,o (the dead f slot gets a copy of o),
      * pre-scale the sigmoid (i/o) columns and biases by 0.5 so the kernel can use
        sigmoid(z) = 0.5*tanh(z/2) + 0.5 with a single tanh pass per gate slab,
      * fold the two biases (biases stay f32),
      * zero-pad the layer-1 weight to (4H, 4H): the layer-0 hidden state lives in
        lane block 0, so only rows [0, H) are non-zero,
      * cast matmul operands to bf16 (MXU-native path; pass jnp.float32 to disable).
    W_hh0 / W_hh1 are dropped: with seq_len == 1 and zero initial state they only
    ever multiply zeros, so they are never DMA'd."""
    H = raw["whh0"].shape[1]
    assert 4 * H == 128, "lane tricks assume 4*hidden_dim == 128"
    idx = jnp.arange(H)
    perm = jnp.concatenate([idx, 3 * H + idx, 2 * H + idx, 3 * H + idx])   # [i, o, g, o]
    scale = jnp.concatenate([jnp.full((H,), 0.5, jnp.float32),   # i  (sigmoid)
                             jnp.full((H,), 0.5, jnp.float32),   # o  (sigmoid)
                             jnp.ones((H,), jnp.float32),        # g  (tanh)
                             jnp.full((H,), 0.5, jnp.float32)])  # o  (sigmoid)

    def prep_w(w):   # (4H, in) torch layout -> (in, 4H): reorder + pre-scale columns, cast
        return (w[perm, :].T * scale[None, :]).astype(matmul_dtype)

    def prep_b(bih, bhh):   # fold, reorder, pre-scale; (1, 4H) f32 for broadcast
        return (((bih + bhh)[perm]) * scale)[None, :]

    wih1T = prep_w(raw["wih1"])                                           # (H, 4H)
    wih1T_pad = jnp.zeros((4 * H, 4 * H), matmul_dtype).at[:H, :].set(wih1T)

    return {
        "wih0T": prep_w(raw["wih0"]), "b0": prep_b(raw["bih0"], raw["bhh0"]),
        "wih1T": wih1T_pad,           "b1": prep_b(raw["bih1"], raw["bhh1"]),
    }


def _reference(x_nchw, raw):
    """Pure-JAX reference implementing the FULL (unoptimized) 2-layer LSTM cell math
    with zero initial state and the raw PyTorch-layout weights.  Checks that dropping
    W_hh / the f gate and the lane/identity tricks preserve semantics."""
    B = x_nchw.shape[0]
    x = x_nchw.reshape(B, -1)
    H = raw["whh0"].shape[1]

    def cell(inp, wih, whh, bih, bhh, h_prev, c_prev):
        gates = inp @ wih.T + h_prev @ whh.T + bih + bhh
        i = jax.nn.sigmoid(gates[:, 0:H])
        f = jax.nn.sigmoid(gates[:, H:2 * H])
        g = jnp.tanh(gates[:, 2 * H:3 * H])
        o = jax.nn.sigmoid(gates[:, 3 * H:4 * H])
        c = f * c_prev + i * g
        return o * jnp.tanh(c), c

    z = jnp.zeros((B, H), jnp.float32)
    h0, _ = cell(x, raw["wih0"], raw["whh0"], raw["bih0"], raw["bhh0"], z, z)
    h1, _ = cell(h0, raw["wih1"], raw["whh1"], raw["bih1"], raw["bhh1"], z, z)
    return h1.reshape(B, 1, H)


if __name__ == "__main__":
    # Small demo: batch 32 -> two grid steps of tb=16 (multi-step "parallel" grid,
    # full vreg sublanes); C*H*W = 256 flattened input; hidden_dim = 32 (4H = 128).
    B, C, Hs, Ws = 32, 4, 8, 8
    input_size = C * Hs * Ws          # 256
    hidden_dim = 32

    key = jax.random.PRNGKey(0)
    kx, kp = jax.random.split(key)
    x = jax.random.normal(kx, (B, C, Hs, Ws), jnp.float32)

    raw = init_torch_params(kp, input_size, hidden_dim)
    params = prepare_params(raw)      # bf16 matmul operands, f32 gate math

    y = lstm_forward(x, params)
    y = jax.block_until_ready(y)

    y_ref = _reference(x, raw)
    assert y.shape == (B, 1, hidden_dim)
    # bf16 matmul operands => tolerance loosened vs the pure-f32 reference.
    err = float(jnp.max(jnp.abs(y - y_ref)))
    assert jnp.allclose(y, y_ref, atol=2e-2, rtol=2e-2), err

    print("KERNEL_OK")
</pallas_src>

<mosaic_0001>
module attributes {stable_mosaic.version = 11 : i64} {
  func.func @lstm_kernel(%arg0: i32, %arg1: memref<16x256xf32, #tpu.memory_space<vmem>>, %arg2: memref<256x128xbf16, #tpu.memory_space<vmem>>, %arg3: memref<1x128xf32, #tpu.memory_space<vmem>>, %arg4: memref<128x128xbf16, #tpu.memory_space<vmem>>, %arg5: memref<1x128xf32, #tpu.memory_space<vmem>>, %arg6: memref<16x32xf32, #tpu.memory_space<vmem>>) attributes {dimension_semantics = [#tpu.dimension_semantics<parallel>], iteration_bounds = array<i64: 2>, scalar_prefetch = 0 : i64, scratch_operands = 0 : i64, tpu.core_type = #tpu.core_type<tc>, window_params = [{transform_indices = @transform_0, window_bounds = array<i64: 16, 256>}, {pipeline_mode = #tpu.pipeline_mode<synchronous>, transform_indices = @transform_1, window_bounds = array<i64: 256, 128>}, {pipeline_mode = #tpu.pipeline_mode<synchronous>, transform_indices = @transform_2, window_bounds = array<i64: 1, 128>}, {pipeline_mode = #tpu.pipeline_mode<synchronous>, transform_indices = @transform_3, window_bounds = array<i64: 128, 128>}, {pipeline_mode = #tpu.pipeline_mode<synchronous>, transform_indices = @transform_4, window_bounds = array<i64: 1, 128>}, {transform_indices = @transform_5, window_bounds = array<i64: 16, 32>}]} {
    %0 = tpu.iota {dimensions = array<i32: 1>} : vector<16x128xi32>
    %c32_i32 = arith.constant 32 : i32
    %1 = vector.broadcast %c32_i32 : i32 to vector<16x128xi32>
    %2 = arith.cmpi slt, %0, %1 : vector<16x128xi32>
    %c0 = arith.constant 0 : index
    %c0_0 = arith.constant 0 : index
    %3 = vector.load %arg1[%c0, %c0_0] : memref<16x256xf32, #tpu.memory_space<vmem>>, vector<16x256xf32>
    %4 = arith.truncf %3 : vector<16x256xf32> to vector<16x256xbf16>
    %c0_1 = arith.constant 0 : index
    %c0_2 = arith.constant 0 : index
    %5 = vector.load %arg2[%c0_1, %c0_2] : memref<256x128xbf16, #tpu.memory_space<vmem>>, vector<256x128xbf16>
    %cst = arith.constant dense<0.000000e+00> : vector<16x128xf32>
    %6 = tpu.matmul %4, %5, %cst {dimension_numbers = #tpu.dot_dimension_numbers<[1], [0], [0], [1], [0, 0, 1, 1], [], []>} : vector<16x256xbf16>, vector<256x128xbf16>, vector<16x128xf32> -> vector<16x128xf32>
    %c0_3 = arith.constant 0 : index
    %c0_4 = arith.constant 0 : index
    %7 = vector.load %arg3[%c0_3, %c0_4] : memref<1x128xf32, #tpu.memory_space<vmem>>, vector<1x128xf32>
    %8 = vector.broadcast %7 : vector<1x128xf32> to vector<16x128xf32>
    %9 = arith.addf %6, %8 : vector<16x128xf32>
    %10 = math.tanh %9 : vector<16x128xf32>
    %cst_5 = arith.constant 5.000000e-01 : f32
    %11 = vector.broadcast %cst_5 : f32 to vector<16x128xf32>
    %12 = arith.mulf %11, %10 : vector<16x128xf32>
    %cst_6 = arith.constant 5.000000e-01 : f32
    %13 = vector.broadcast %cst_6 : f32 to vector<16x128xf32>
    %14 = arith.addf %12, %13 : vector<16x128xf32>
    %c64_i32 = arith.constant 64 : i32
    %15 = tpu.dynamic_rotate %10 by %c64_i32 dim 1 : vector<16x128xf32>, i32 -> vector<16x128xf32>
    %16 = arith.mulf %14, %15 : vector<16x128xf32>
    %17 = math.tanh %16 : vector<16x128xf32>
    %cst_7 = arith.constant 0.000000e+00 : f32
    %18 = vector.broadcast %cst_7 : f32 to vector<16x128xf32>
    %19 = arith.select %2, %17, %18 : vector<16x128xi1>, vector<16x128xf32>
    %c32_i32_8 = arith.constant 32 : i32
    %20 = tpu.dynamic_rotate %14 by %c32_i32_8 dim 1 : vector<16x128xf32>, i32 -> vector<16x128xf32>
    %21 = arith.mulf %20, %19 : vector<16x128xf32>
    %22 = arith.truncf %21 : vector<16x128xf32> to vector<16x128xbf16>
    %c0_9 = arith.constant 0 : index
    %c0_10 = arith.constant 0 : index
    %23 = vector.load %arg4[%c0_9, %c0_10] : memref<128x128xbf16, #tpu.memory_space<vmem>>, vector<128x128xbf16>
    %cst_11 = arith.constant dense<0.000000e+00> : vector<16x128xf32>
    %24 = tpu.matmul %22, %23, %cst_11 {dimension_numbers = #tpu.dot_dimension_numbers<[1], [0], [0], [1], [0, 0, 1, 1], [], []>} : vector<16x128xbf16>, vector<128x128xbf16>, vector<16x128xf32> -> vector<16x128xf32>
    %c0_12 = arith.constant 0 : index
    %c0_13 = arith.constant 0 : index
    %25 = vector.load %arg5[%c0_12, %c0_13] : memref<1x128xf32, #tpu.memory_space<vmem>>, vector<1x128xf32>
    %26 = vector.broadcast %25 : vector<1x128xf32> to vector<16x128xf32>
    %27 = arith.addf %24, %26 : vector<16x128xf32>
    %28 = math.tanh %27 : vector<16x128xf32>
    %cst_14 = arith.constant 5.000000e-01 : f32
    %29 = vector.broadcast %cst_14 : f32 to vector<16x128xf32>
    %30 = arith.mulf %29, %28 : vector<16x128xf32>
    %cst_15 = arith.constant 5.000000e-01 : f32
    %31 = vector.broadcast %cst_15 : f32 to vector<16x128xf32>
    %32 = arith.addf %30, %31 : vector<16x128xf32>
    %c64_i32_16 = arith.constant 64 : i32
    %33 = tpu.dynamic_rotate %28 by %c64_i32_16 dim 1 : vector<16x128xf32>, i32 -> vector<16x128xf32>
    %34 = arith.mulf %32, %33 : vector<16x128xf32>
    %35 = math.tanh %34 : vector<16x128xf32>
    %cst_17 = arith.constant 0.000000e+00 : f32
    %36 = vector.broadcast %cst_17 : f32 to vector<16x128xf32>
    %37 = arith.select %2, %35, %36 : vector<16x128xi1>, vector<16x128xf32>
    %c32_i32_18 = arith.constant 32 : i32
    %38 = tpu.dynamic_rotate %32 by %c32_i32_18 dim 1 : vector<16x128xf32>, i32 -> vector<16x128xf32>
    %39 = arith.mulf %38, %37 : vector<16x128xf32>
    %40 = vector.extract_strided_slice %39 {offsets = [0, 0], sizes = [16, 32], strides = [1, 1]} : vector<16x128xf32> to vector<16x32xf32>
    %c0_19 = arith.constant 0 : index
    %c0_20 = arith.constant 0 : index
    %41 = vector.load %arg6[%c0_19, %c0_20] : memref<16x32xf32, #tpu.memory_space<vmem>>, vector<16x32xf32>
    tpu.vector_store %arg6[%c0_19, %c0_20], %40 {strides = array<i32>} : memref<16x32xf32, #tpu.memory_space<vmem>>, vector<16x32xf32>,
    return
  }
  func.func @transform_0(%arg0: i32) -> (i32, i32) {
    %c0_i32 = arith.constant 0 : i32
    %c0_i32_0 = arith.constant 0 : i32
    return %arg0, %c0_i32 : i32, i32
  }
  func.func @transform_1(%arg0: i32) -> (i32, i32) {
    %c0_i32 = arith.constant 0 : i32
    %c0_i32_0 = arith.constant 0 : i32
    %c0_i32_1 = arith.constant 0 : i32
    return %c0_i32, %c0_i32_0 : i32, i32
  }
  func.func @transform_2(%arg0: i32) -> (i32, i32) {
    %c0_i32 = arith.constant 0 : i32
    %c0_i32_0 = arith.constant 0 : i32
    %c0_i32_1 = arith.constant 0 : i32
    return %c0_i32, %c0_i32_0 : i32, i32
  }
  func.func @transform_3(%arg0: i32) -> (i32, i32) {
    %c0_i32 = arith.constant 0 : i32
    %c0_i32_0 = arith.constant 0 : i32
    %c0_i32_1 = arith.constant 0 : i32
    return %c0_i32, %c0_i32_0 : i32, i32
  }
  func.func @transform_4(%arg0: i32) -> (i32, i32) {
    %c0_i32 = arith.constant 0 : i32
    %c0_i32_0 = arith.constant 0 : i32
    %c0_i32_1 = arith.constant 0 : i32
    return %c0_i32, %c0_i32_0 : i32, i32
  }
  func.func @transform_5(%arg0: i32) -> (i32, i32) {
    %c0_i32 = arith.constant 0 : i32
    %c0_i32_0 = arith.constant 0 : i32
    return %arg0, %c0_i32 : i32, i32
  }
}

</mosaic_0001>

<bundles_post_ra>
// kernel: tpu_custom_call.1
= control target key start
LH: loop header
LB: loop body
LE: loop exit
PB: predicated region body
PF: predicated region fallthrough
CT: control target
= control target key end

     0   :  { %10 = vsyncpa [#allocation3], 0  ;;  %s1404_s0 = inlined_call_operand.hbm [shape: f32[32,256], index: 0, kind: input, shape index: {}]   ;;  %s1405_s1 = inlined_call_operand.hbm [shape: bf16[256,128], index: 1, kind: input, shape index: {}]   ;;  %s1406_s2 = inlined_call_operand.vmem [shape: f32[1,128], index: 2, kind: input, shape index: {}]   ;;  %s1407_s3 = inlined_call_operand.hbm [shape: bf16[128,128], index: 3, kind: input, shape index: {}]   ;;  %s1408_s4 = inlined_call_operand.vmem [shape: f32[1,128], index: 4, kind: input, shape index: {}]   ;;  %s1409_s5 = inlined_call_operand.hbm [shape: f32[32,32], index: 5, kind: output, shape index: {}]  }
   0x1   :  { %12 = vsyncpa [#allocation3 + $0x1], 0 }
   0x2   :  { %13 = vsyncpa [#allocation6], 0 }
   0x3   :  { %14 = vsyncpa [#allocation4], 0 }
   0x4   :  { %16 = vsyncpa [#allocation4 + $0x1], 0  ;;  %s1145_s18 = smov 0   ;;  %s1147_s19 = smov 0  }
   0x5   :  { %s1149_s20 = smov 0   ;;  %s1151_s21 = smov 0  }
   0x6 LB: > { %s1166_s22 = sadd.s32 4294967295, %s1099_s21   ;;  %s727_s23 = sadd.s32 4294967294, %s1099_s21   ;;  %s1099_s21 = sphi %s1151_s21, %s1429_s21   ;;  %s1095_s20 = sphi %s1149_s20, %s1428_s20   ;;  %s1091_s19 = sphi %s1147_s19, %s1427_s19   ;;  %s1087_s18 = sphi %s1145_s18, %s1426_s18  }
   0x7   : > { %p42_p0 = scmp.ne.s32.totalorder %s1091_s19, %s1087_s18  ;;  %p1410_p1 = scmp.eq.s32.totalorder %s1166_s22, 0 }
   0x8   : > { %p156_p3 = scmp.eq.s32.totalorder %s727_s23, 1  ;;  %p728_p5 = scmp.ge.s32.totalorder %s1099_s21, 1 }
   0x9   : > { %p1175_p4 = por %p1410_p1, %p42_p0  ;;  %p163_p7 = scmp.lt.s32.totalorder %s1099_s21, 3 }
   0xa   : > { %p1180_p6 = por %p156_p3, %p42_p0  ;;  %s1101_s27 = smov [#allocation5]  }
   0xb   : > { %s1413_s24 = scalar_select %p1175_p4, 1, 0 }
   0xc   : > { %s1414_s25 = scalar_select %p1180_p6, 1, 0 }
   0xd   : > { %p1185_p8 = pnand %p728_p5, %p163_p7  ;;  %s175_s28 = sshll.u32 %s1101_s27, 4  ;;  %s1189_s28 = int_to_ptr.vmem [resolvable:$true] %s175_s28 }
   0xe   : > { %s1102_s30 = smov [#allocation7]   ;;  %s943_s9 = scalar_lea.hbm %s1405_s1, 2048 }
   0xf   : > { %p838_p9 = pneg %p1185_p8  ;;  %s191_s6 = sshll.u32 %s1102_s30, 4  ;;  %s1200_s6 = int_to_ptr.vmem [resolvable:$true] %s191_s6 }
  0x10   : > { %p944_p12 = scmp.ne.s32.totalorder %s1405_s1, %s943_s9  ;;  %p950_p5 = scmp.lt.u32.totalorder %s943_s9, %s1405_s1 }
  0x11   : > { %p1196_p11 = pnand %p838_p9, %p1410_p1 }
  0x13   : > { %p945_p13 = pneg %p1196_p11 }
  0x15   : > { %p946_p0 = pnand %p945_p13, %p944_p12 }
  0x17   : > { %p947_p3 = pneg %p946_p0 }
  0x19   : > { %p952_p7 = pnand %p950_p5, %p947_p3 }
  0x1b   : > { %955 = shalt.err (!%p952_p7)
}
  0x1c   : > { %s956_s14 = scalar_lea.vmem %s1189_s28, 2048  ;;  %p964_p2 = scmp.lt.s32.totalorder %s1189_s28, %s1189_s28 }
  0x1d   : > { %p957_p9 = scmp.ne.s32.totalorder %s1189_s28, %s956_s14  ;;  %p965_p12 = scmp.lt.s32.totalorder %s956_s14, %s956_s14 }
  0x1f   : > { %p959_p10 = pnand %p957_p9, %p945_p13  ;;  %p966_p0 = por %p965_p12, %p964_p2 }
  0x21   : > { %p960_p1 = pneg %p959_p10 }
  0x23   : > { %p967_p6 = pnand %p966_p0, %p960_p1 }
  0x25   : > { %970 = shalt.err (!%p967_p6)
}
  0x26   : > { %s1103_s15 = smov 64   ;;  %s1104_s16 = smov 4  }
  0x27   : > { %841 = dma.hbm_to_vmem [thread:$0]  (!%p1196_p11), %s1405_s1, 2048, %s1189_s28, [#allocation6], %s1103_s15, %s1103_s15, %s1104_s16  }
  0x28   : > { %s971_s7 = scalar_lea.hbm %s1407_s3, 1024 }
  0x29   : > { %p972_p2 = scmp.ne.s32.totalorder %s1407_s3, %s971_s7  ;;  %p978_p10 = scmp.lt.u32.totalorder %s971_s7, %s1407_s3 }
  0x2b   : > { %p974_p1 = pnand %p972_p2, %p945_p13 }
  0x2d   : > { %p975_p6 = pneg %p974_p1 }
  0x2f   : > { %p980_p3 = pnand %p978_p10, %p975_p6 }
  0x31   : > { %983 = shalt.err (!%p980_p3)
}
  0x32   : > { %s984_s28 = scalar_lea.vmem %s1200_s6, 1024  ;;  %p992_p12 = scmp.lt.s32.totalorder %s1200_s6, %s1200_s6 }
  0x33   : > { %p985_p5 = scmp.ne.s32.totalorder %s1200_s6, %s984_s28  ;;  %p993_p0 = scmp.lt.s32.totalorder %s984_s28, %s984_s28 }
  0x35   : > { %p987_p7 = pnand %p985_p5, %p945_p13  ;;  %p994_p2 = por %p993_p0, %p992_p12 }
  0x37   : > { %p988_p9 = pneg %p987_p7 }
  0x39   : > { %p995_p1 = pnand %p994_p2, %p988_p9 }
  0x3b   : > { %998 = shalt.err (!%p995_p1)
}
  0x3c   : > { %844 = dma.hbm_to_vmem [thread:$0]  (!%p1196_p11), %s1407_s3, 1024, %s1200_s6, [#allocation6], %s1103_s15, %s1103_s15, %s1104_s16  }
  0x3d   : > { %s1255_s14 = sadd.s32 1, %s1099_s21   ;;  %s29_s29 = sadd.s32 1, %s1095_s20 }
  0x3e   : > { %s26_s17 = ssub.s32 %s1099_s21, %s1255_s14  ;;  %p36_p13 = scmp.ne.s32.totalorder %s1095_s20, %s1091_s19 }
  0x3f   : > { %p27_p6 = scmp.eq.s32.totalorder %s26_s17, 0  ;;  %p37_p10 = scmp.eq.s32.totalorder %s1099_s21, 0 }
  0x40   : > { %p1417_p3 = scmp.eq.s32.totalorder %s1166_s22, 1  ;;  %p855_p7 = scmp.lt.s32.totalorder %s1099_s21, 2 }
  0x41   : > { %s1271_s27 = scalar_select %p27_p6, %s1095_s20, %s29_s29  }
  0x42   : > { %p1265_p5 = por %p1417_p3, %p36_p13  ;;  %p38_p9 = por %p37_p10, %p36_p13 }
  0x43   : > { %s208_s30 = sand.u32 1, %s1095_s20   ;;  %s773_s6 = sshll.u32 %s1099_s21, 9 }
  0x44   : > { %s1418_s23 = scalar_select %p1265_p5, 1, 0 }
  0x45   : > { %s732_s7 = sshll.u32 %s208_s30, 5  ;;  %s1278_s8 = scalar_lea.hbm %s1404_s0, %s773_s6 }
  0x46   : > { %s212_s9 = scalar_lea.vmem [#allocation2], %s732_s7  ;;  %p1282_p11 = pnand %p855_p7, %p38_p9 }
  0x47   : > { %s220_s10 = sshll.u32 %s212_s9, 4  ;;  %s1286_s28 = scalar_lea.sflag [#allocation3], %s208_s30  ;;  %s1280_s10 = int_to_ptr.vmem [resolvable:$true] %s220_s10 }
  0x48   : > { %s999_s12 = scalar_lea.hbm %s1278_s8, 512  ;;  %p1001_p0 = pneg %p1282_p11 }
  0x49   : > { %p1000_p12 = scmp.ne.s32.totalorder %s1278_s8, %s999_s12  ;;  %s1004_s17 = scalar_lea.hbm %s1404_s0, 1024 }
  0x4a   : > { %p1005_p13 = scmp.lt.u32.totalorder %s1278_s8, %s1404_s0  ;;  %p1006_p6 = scmp.lt.u32.totalorder %s1004_s17, %s999_s12 }
  0x4b   : > { %p1002_p2 = pnand %p1001_p0, %p1000_p12  ;;  %p1008_p3 = scmp.lt.u32.totalorder %s999_s12, %s1278_s8 }
  0x4c   : > { %p1007_p10 = por %p1006_p6, %p1005_p13 }
  0x4d   : > { %p1003_p1 = pneg %p1002_p2 }
  0x4e   : > { %p1009_p7 = por %p1008_p3, %p1007_p10 }
  0x50   : > { %p1010_p9 = pnand %p1009_p7, %p1003_p1 }
  0x52   : > { %1013 = shalt.err (!%p1010_p9)
}
  0x53   : > { %s1014_s30 = scalar_lea.vmem %s1280_s10, 512  ;;  %s1105_s15 = smov [#allocation2]  }
  0x54   : > { %p1015_p12 = scmp.ne.s32.totalorder %s1280_s10, %s1014_s30  ;;  %s1019_s16 = sshll.u32 %s1105_s15, 4  ;;  %s1020_s16 = int_to_ptr.vmem [resolvable:$false] %s1019_s16 }
  0x55   : > { %s1021_s9 = scalar_lea.vmem %s1020_s16, 1024  ;;  %p1022_p4 = scmp.lt.s32.totalorder %s1280_s10, %s1020_s16 }
  0x56   : > { %p1017_p2 = pnand %p1015_p12, %p1001_p0  ;;  %p1023_p13 = scmp.lt.s32.totalorder %s1021_s9, %s1014_s30 }
  0x58   : > { %p1018_p5 = pneg %p1017_p2  ;;  %p1024_p6 = por %p1023_p13, %p1022_p4 }
  0x5a   : > { %p1025_p10 = pnand %p1024_p6, %p1018_p5 }
  0x5c   : > { %1028 = shalt.err (!%p1025_p10)
}
  0x5d   : > { %s1106_s12 = smov 256   ;;  %s1107_s13 = smov 16  }
  0x5e   : > { %848 = dma.hbm_to_vmem [thread:$0]  (!%p1282_p11), %s1278_s8, 512, %s1280_s10, %s1286_s28, %s1106_s12, %s1106_s12, %s1107_s13  }
  0x5f   : > { %232 = sbr.rel (%p1185_p8) target bundleno = 877 (0x36d), region = 40  ;;  %s1317_s29 = sand.u32 (!%p1185_p8), 1, %s1091_s19  }
  0x60   : > { %s737_s17 = sshll.u32 (!%p1185_p8), %s1317_s29, 5  ;;  %s235_s7 = scalar_lea.sflag (!%p1185_p8), [#allocation3], %s1317_s29 }
  0x61   : > { %s1321_s6 = scalar_lea.vmem (!%p1185_p8), [#allocation2], %s737_s17  ;;  %p1420_p4 = scmp.ne.s32.totalorder (!%p1185_p8), %s1413_s24, 0 }
  0x66   : > { %1074 = dma.done.wait (%p1420_p4), %s235_s7, 512  }
  0x67   : > { %1076 = vsyncadd (%p1420_p4), %s235_s7, 4294966784  ;;  %p1421_p5 = scmp.eq.s32.totalorder %s1166_s22, 0 }
  0x69   : > { %1078 = dma.done.wait (%p1421_p5), [#allocation6], 3072   ;;  %p1422_p8 = pmov %p1421_p5 }
  0x6a   : > { %v903_v0 = vld [vmem:[#allocation5 + $0x40] sm:$0xff]   ;;  %v905_v2 = vld [vmem:[#allocation5 + $0x48] sm:$0xff]   ;;  %v907_v4 = vld [vmem:[#allocation5 + $0x50] sm:$0xff]   ;;  %v1108_v23 = vmov 0.0   ;;  %s1109_s8 = smov 64   ;;  %s1110_s10 = smov 32   ;;  %v276_v50 = vlaneseq }
  0x6b   : > { %1080 = vsyncadd (%p1422_p8), [#allocation6], 4294964224  ;;  %v904_v1 = vld [vmem:[#allocation5] sm:$0xff]   ;;  %775 = vmatprep.subr.bf16.mxu0 %v903_v0  ;;  %v906_v3 = vld [vmem:[#allocation5 + $0x8] sm:$0xff]   ;;  %806 = vmatprep.subr.bf16.mxu1 %v1108_v23  ;;  %vm1111_vm0 = vmmov 0   ;;  %s740_s30 = sshll.u32 %s1317_s29, 4 }
  0x6c   : > { %776 = vmatpush3.bf16.msra.mxu0 %v904_v1  ;;  %v908_v5 = vld [vmem:[#allocation5 + $0x10] sm:$0xff]   ;;  %v909_v6 = vld [vmem:[#allocation5 + $0x58] sm:$0xff]   ;;  %v911_v8 = vld [vmem:[#allocation5 + $0x60] sm:$0xff]   ;;  %822 = vmatprep.mubr.msk.bf16.mxu1 %vm1111_vm0, %v1108_v23  ;;  %v277_v51 = vand.u32 127, %v276_v50  ;;  %s272_s15 = scalar_lea.vmem [#allocation8], %s740_s30  ;;  %s774_s9 = sshll.u32 %s1166_s22, 8 }
  0x6d   : > { %777 = vmatprep.subr.bf16.mxu0 %v905_v2  ;;  %v910_v7 = vld [vmem:[#allocation5 + $0x18] sm:$0xff]   ;;  %v912_v9 = vld [vmem:[#allocation5 + $0x20] sm:$0xff]   ;;  %v913_v10 = vld [vmem:[#allocation5 + $0x68] sm:$0xff]   ;;  %s635_s16 = sshll.u32 %s272_s15, 4  ;;  %vm618_vm2 = vcmask 261120   ;;  %s1360_s17 = scalar_lea.hbm %s1409_s5, %s774_s9  ;;  %s1354_s16 = int_to_ptr.vmem [resolvable:$true] %s635_s16 }
  0x6e   : > { %v280_v11 = vld [vmem:[%s1321_s6 + $0x8] sm:$0xff]  ;;  %v282_v12 = vld [vmem:[%s1321_s6 + $0x18] sm:$0xff]  ;;  %v915_v15 = vld [vmem:[#allocation5 + $0x70] sm:$0xff]   ;;  %vm278_vm1 = vcmp.lt.s32.totalorder %v277_v51, 32  ;;  %s622_s22 = scalar_lea.sflag [#allocation4], %s1317_s29  ;;  %s1029_s7 = scalar_lea.vmem %s1354_s16, 256 }
  0x6f   : > { %v914_v13 = vld [vmem:[#allocation5 + $0x28] sm:$0xff]   ;;  %v284_v14 = vpack.c.bf16 %v282_v12, %v280_v11  ;;  %v916_v16 = vld [vmem:[#allocation5 + $0x30] sm:$0xff]   ;;  %v917_v17 = vld [vmem:[#allocation5 + $0x78] sm:$0xff]   ;;  %p1030_p11 = scmp.ne.s32.totalorder %s1354_s16, %s1029_s7  ;;  %p1423_p0 = scmp.ne.s32.totalorder %s1418_s23, 0 }
  0x70   : > { %778 = vmatpush3.bf16.msra.mxu0 %v906_v3  ;;  %v918_v18 = vld [vmem:[#allocation5 + $0x38] sm:$0xff]   ;;  %v279_v19 = vld [vmem:[%s1321_s6] sm:$0xff]  ;;  %v281_v20 = vld [vmem:[%s1321_s6 + $0x10] sm:$0xff]  ;;  %s1112_s6 = smov [#allocation8]  }
  0x71   : > { %779 = vmatprep.subr.bf16.mxu0 %v907_v4  ;;  %452 = vmatprep.mubr.bf16.mxu0 %v284_v14  ;;  %v283_v21 = vpack.c.bf16 %v281_v20, %v279_v19  ;;  %v919_v22 = vld [vmem:[#allocation7] sm:$0xff]   ;;  %v920_v24 = vld [vmem:[#allocation7 + $0x8] sm:$0xff]   ;;  %v921_v25 = vld [vmem:[#allocation7 + $0x10] sm:$0xff]   ;;  %p1031_p1 = pnand %p1030_p11, %p1423_p0  ;;  %s1033_s24 = sshll.u32 %s1112_s6, 4  ;;  %s1034_s24 = int_to_ptr.vmem [resolvable:$false] %s1033_s24 }
  0x72   : > { %807 = vmatpush3.bf16.msra.mxu1 %v919_v22  ;;  %v741_v27 = vld [vmem:[%s1406_s2] ss:$0 sm:$0xff]  ;;  %v922_v34 = vld [vmem:[#allocation7 + $0x18] sm:$0xff]   ;;  %v924_v37 = vld [vmem:[#allocation7 + $0x28] sm:$0xff]   ;;  %s1035_s26 = scalar_lea.vmem %s1034_s24, 512  ;;  %p1036_p7 = scmp.lt.s32.totalorder %s1354_s16, %s1034_s24 }
  0x73   : > { %808 = vmatprep.subr.bf16.mxu1 %v1108_v23  ;;  %v923_v36 = vld [vmem:[#allocation7 + $0x20] sm:$0xff]   ;;  %v925_v40 = vld [vmem:[#allocation7 + $0x30] sm:$0xff]   ;;  %v926_v44 = vld [vmem:[#allocation7 + $0x38] sm:$0xff]   ;;  %p1032_p3 = pneg %p1031_p1  ;;  %p1037_p9 = scmp.lt.s32.totalorder %s1035_s26, %s1029_s7 }
  0x74   : > { %780 = vmatpush3.bf16.msra.mxu0 %v908_v5  ;;  %v758_v61 = vld [vmem:[%s1408_s4] ss:$0 sm:$0xff] }
  0x75   : > { %781 = vmatprep.subr.bf16.mxu0 %v909_v6  ;;  %p1038_p12 = por %p1037_p9, %p1036_p7 }
  0x76   : > { %809 = vmatpush3.bf16.msra.mxu1 %v920_v24 }
  0x77   : > { %810 = vmatprep.subr.bf16.mxu1 %v1108_v23  ;;  %p1039_p2 = pnand %p1038_p12, %p1032_p3 }
  0x78   : > { %782 = vmatpush3.bf16.msra.mxu0 %v910_v7 }
  0x79   : > { %783 = vmatprep.subr.bf16.mxu0 %v911_v8 }
  0x7a   : > { %811 = vmatpush3.bf16.msra.mxu1 %v921_v25 }
  0x7b   : > { %812 = vmatprep.subr.bf16.mxu1 %v1108_v23 }
  0x7c   : > { %784 = vmatpush3.bf16.msra.mxu0 %v912_v9 }
  0x7d   : > { %785 = vmatprep.subr.bf16.mxu0 %v913_v10 }
  0x7e   : > { %813 = vmatpush3.bf16.msra.mxu1 %v922_v34 }
  0x7f   : > { %814 = vmatprep.subr.bf16.mxu1 %v1108_v23 }
  0x80   : > { %786 = vmatpush3.bf16.msra.mxu0 %v914_v13 }
  0x81   : > { %787 = vmatprep.subr.bf16.mxu0 %v915_v15 }
  0x82   : > { %815 = vmatpush3.bf16.msra.mxu1 %v923_v36 }
  0x83   : > { %816 = vmatprep.subr.bf16.mxu1 %v1108_v23 }
  0x84   : > { %788 = vmatpush3.bf16.msra.mxu0 %v916_v16 }
  0x85   : > { %789 = vmatprep.subr.bf16.mxu0 %v917_v17 }
  0x86   : > { %817 = vmatpush3.bf16.msra.mxu1 %v924_v37 }
  0x87   : > { %818 = vmatprep.subr.bf16.mxu1 %v1108_v23 }
  0x88   : > { %790 = vmatpush3.bf16.msra.mxu0 %v918_v18 }
  0x8a   : > { %819 = vmatpush3.bf16.msra.mxu1 %v925_v40 }
  0x8b   : > { %453 = vmatmul.mubr.bf16.vlgmr.msra.gmra.mrb[0].mxu0 %v283_v21  ;;  %820 = vmatprep.subr.bf16.mxu1 %v1108_v23 }
  0x8e   : > { %821 = vmatpush3.bf16.msra.mxu1 %v926_v44 }
 0x15e   : > { %v791_v26 = vpop.f32.mrb[0].mxu0 }
 0x15f   : > { %v792_v28 = vpop.f32.mrb[1].mxu0 }
 0x160   : > { %v793_v29 = vadd.f32 %v792_v28, %v791_v26  ;;  %v794_v30 = vpop.f32.mrb[2].mxu0 }
 0x161   : > { %v795_v31 = vpop.f32.mrb[3].mxu0 }
 0x162   : > { %v455_v32 = vadd.f32 %v793_v29, %v741_v27  ;;  %v796_v33 = vadd.f32 %v795_v31, %v794_v30 }
 0x164   : > { %927 = vtanh.f32 %v455_v32  ;;  %v458_v35 = vadd.f32 %v796_v33, %v741_v27 }
 0x166   : > { %929 = vtanh.f32 %v458_v35 }
 0x16e   : > { %v928_v38 = vpop.eup %927 }
 0x16f   : > { %467 = vrot.lane.b32.xlu0 %v928_v38, %s1109_s8  ;;  %v463_v39 = vmul.f32 0.5, %v928_v38 }
 0x170   : > { %v930_v41 = vpop.eup %929 }
 0x171   : > { %v465_v42 = vadd.f32 0.5, %v463_v39  ;;  %v464_v43 = vmul.f32 0.5, %v930_v41 }
 0x173   : > { %469 = vrot.lane.b32.xlu0 %v930_v41, %s1109_s8  ;;  %477 = vrot.lane.b32.xlu1 %v465_v42, %s1110_s10  ;;  %v466_v45 = vadd.f32 0.5, %v464_v43 }
 0x177   : > { %479 = vrot.lane.b32.xlu1 %v466_v45, %s1110_s10 }
 0x1e1   : > { %v468_v46 = vpop.permute.xlu0 %467 }
 0x1e2   : > { %v471_v47 = vmul.f32 %v468_v46, %v465_v42 }
 0x1e4   : > { %931 = vtanh.f32 %v471_v47 }
 0x1e5   : > { %v470_v48 = vpop.permute.xlu0 %469  ;;  %v478_v52 = vpop.permute.xlu1 %477 }
 0x1e6   : > { %v472_v49 = vmul.f32 %v470_v48, %v466_v45 }
 0x1e8   : > { %933 = vtanh.f32 %v472_v49 }
 0x1e9   : > { %v480_v57 = vpop.permute.xlu1 %479 }
 0x1ee   : > { %v932_v53 = vpop.eup %931 }
 0x1ef   : > { %v475_v54 = vsel %vm278_vm1, %v932_v53, 0.0 }
 0x1f0   : > { %v481_v58 = vmul.f32 %v478_v52, %v475_v54 }
 0x1f2   : > { %v934_v55 = vpop.eup %933 }
 0x1f3   : > { %v476_v56 = vsel %vm278_vm1, %v934_v55, 0.0 }
 0x1f4   : > { %v482_v59 = vmul.f32 %v480_v57, %v476_v56 }
 0x1f6   : > { %v483_v60 = vpack.c.bf16 %v482_v59, %v481_v58 }
 0x1f8   : > { %823 = vmatmul.mubr.bf16.vlgmr.msra.gmra.mrb[0].mxu1 %v483_v60 }
 0x2cb   : > { %v589_v62 = vpop.f32.mrb[0].mxu1 }
 0x2cc   : > { %v590_v63 = vadd.f32 %v758_v61, %v589_v62  ;;  %v824_v0 = vpop.f32.mrb[1].mxu1 }
 0x2cd   : > { %v592_v1 = vpop.f32.mrb[2].mxu1 }
 0x2ce   : > { %935 = vtanh.f32 %v590_v63  ;;  %v593_v2 = vadd.f32 %v758_v61, %v592_v1  ;;  %v825_v3 = vpop.f32.mrb[3].mxu1 }
 0x2d0   : > { %937 = vtanh.f32 %v593_v2 }
 0x2d8   : > { %v936_v4 = vpop.eup %935 }
 0x2d9   : > { %602 = vrot.lane.b32.xlu0 %v936_v4, %s1109_s8  ;;  %v598_v5 = vmul.f32 0.5, %v936_v4 }
 0x2da   : > { %v938_v6 = vpop.eup %937 }
 0x2db   : > { %604 = vrot.lane.b32.xlu1 %v938_v6, %s1109_s8  ;;  %v600_v7 = vadd.f32 0.5, %v598_v5  ;;  %v599_v8 = vmul.f32 0.5, %v938_v6 }
 0x2dd   : > { %612 = vrot.lane.b32.xlu0 %v600_v7, %s1110_s10  ;;  %v601_v9 = vadd.f32 0.5, %v599_v8 }
 0x2df   : > { %614 = vrot.lane.b32.xlu1 %v601_v9, %s1110_s10 }
 0x34b   : > { %v603_v10 = vpop.permute.xlu0 %602 }
 0x34c   : > { %v606_v11 = vmul.f32 %v603_v10, %v600_v7 }
 0x34d   : > { %v605_v12 = vpop.permute.xlu1 %604 }
 0x34e   : > { %939 = vtanh.f32 %v606_v11  ;;  %v607_v13 = vmul.f32 %v605_v12, %v601_v9 }
 0x34f   : > { %v613_v15 = vpop.permute.xlu0 %612 }
 0x350   : > { %941 = vtanh.f32 %v607_v13 }
 0x351   : > { %v615_v19 = vpop.permute.xlu1 %614 }
 0x358   : > { %v940_v14 = vpop.eup %939 }
 0x359   : > { %v610_v16 = vsel %vm278_vm1, %v940_v14, 0.0 }
 0x35a   : > { %v942_v17 = vpop.eup %941  ;;  %v616_v18 = vmul.f32 %v613_v15, %v610_v16 }
 0x35b   : > { %v611_v20 = vsel %vm278_vm1, %v942_v17, 0.0 }
 0x35c   : > { %619 = vst.msk [vmem:[%s272_s15] sm:$0xff] %vm618_vm2, %v616_v18  ;;  %v617_v21 = vmul.f32 %v615_v19, %v611_v20 }
 0x35e   : > { %620 = vst.msk [vmem:[%s272_s15 + $0x8] sm:$0xff] %vm618_vm2, %v617_v21 }
 0x35f   : > { %1042 = shalt.err (!%p1039_p2)
}
 0x360   : > { %s1043_s8 = scalar_lea.hbm %s1360_s17, 256  ;;  %s1047_s28 = scalar_lea.hbm %s1409_s5, 512 }
 0x361   : > { %p1044_p13 = scmp.ne.s32.totalorder %s1360_s17, %s1043_s8  ;;  %p1048_p4 = scmp.lt.u32.totalorder %s1360_s17, %s1409_s5 }
 0x362   : > { %p1049_p5 = scmp.lt.u32.totalorder %s1047_s28, %s1043_s8  ;;  %p1051_p11 = scmp.lt.u32.totalorder %s1043_s8, %s1360_s17 }
 0x363   : > { %p1045_p6 = pnand %p1044_p13, %p1423_p0 }
 0x364   : > { %p1050_p8 = por %p1049_p5, %p1048_p4 }
 0x365   : > { %p1046_p10 = pneg %p1045_p6 }
 0x366   : > { %p1052_p1 = por %p1051_p11, %p1050_p8 }
 0x368   : > { %p1053_p3 = pnand %p1052_p1, %p1046_p10 }
 0x36a   : > { %1056 = shalt.err (!%p1053_p3)
}
 0x36b   : > { %s1113_s9 = smov 128   ;;  %s1114_s12 = smov 8  }
 0x36c   : > { %836 = dma.vmem_to_hbm [thread:$0]  (%p1423_p0), %s1354_s16, 256, %s1360_s17, %s622_s22, %s1113_s9, %s1113_s9, %s1114_s12  }
 0x36d PF: > { %s650_s13 = sand.u32 1, %s1087_s18   ;;  %p1424_p7 = scmp.ne.s32.totalorder %s1414_s25, 0 }
 0x36e   : > { %p1425_p9 = scmp.ge.s32.totalorder %s1099_s21, 2  ;;  %s651_s7 = scalar_lea.sflag [#allocation4], %s650_s13 }
 0x370   : > { %p850_p12 = pnand %p1425_p9, %p1424_p7 }
 0x372   : > { %1082 = dma.done.wait (!%p850_p12), %s651_s7, 256  }
 0x373   : > { %1084 = vsyncadd (!%p850_p12), %s651_s7, 4294967040  ;;  %p19_p2 = scmp.ge.s32.totalorder %s1255_s14, 4   ;;  %s1426_s18 = smov %s1091_s19 }
 0x374   : > { %s1427_s19 = smov %s1095_s20  ;;  %s1428_s20 = smov %s1271_s27 }
 0x375   : > { %s1429_s21 = smov %s1255_s14  ;;  %21 = sbr.rel (!%p19_p2) target bundleno = 6 (0x6), region = 93 }
 0x37c   :  { %656 = vsyncpa [#allocation3], 1 }
 0x37d   :  { %658 = vsyncpa [#allocation3 + $0x1], 1 }
 0x37e   :  { %659 = vsyncpa [#allocation6], 1 }
 0x37f   :  { %660 = vsyncpa [#allocation4], 1 }
 0x380   :  { %662 = vsyncpa [#allocation4 + $0x1], 1 }

</bundles_post_ra>
